<compile_context>
chip_gen: v5e
topology: v5e:2x2
jax: 0.10.0
libtpu: 0.0.40
codegen_flags: <defaults>
</compile_context>

<pallas_src>
import functools

import jax
import jax.numpy as jnp
from jax.experimental import pallas as pl
from jax.experimental.pallas import tpu as pltpu


def _out_block_kernel(w_ref, x_ref, o_ref, *, cin, cout, use_sigmoid):
    # w_ref: (cout, cin) float32, resident in SMEM.
    # x_ref: (cin, TR, L) float32 block in VMEM (lane axis L is dense).
    # o_ref: (cout, TR, L) float32 block in VMEM.
    planes = [x_ref[ci] for ci in range(cin)]  # each (TR, L), lane-dense

    # 1x1 conv as broadcast FMAs on the VPU (weights are SMEM scalars).
    ys = []
    for co in range(cout):
        acc = planes[0] * w_ref[co, 0]
        for ci in range(1, cin):
            acc = acc + planes[ci] * w_ref[co, ci]
        ys.append(acc)

    if use_sigmoid:
        for co in range(cout):
            o_ref[co] = jax.nn.sigmoid(ys[co]).astype(o_ref.dtype)
    else:
        # Softmax over the channel axis, computed elementwise across the
        # per-channel planes (pure VPU/EUP work, no cross-lane reduction).
        m = ys[0]
        for y in ys[1:]:
            m = jnp.maximum(m, y)
        es = [jnp.exp(y - m) for y in ys]
        denom = es[0]
        for e in es[1:]:
            denom = denom + e
        # Exact reciprocal to stay within the 1e-5 tolerance vs the reference.
        inv = pl.reciprocal(denom, approx=False)
        for co in range(cout):
            o_ref[co] = (es[co] * inv).astype(o_ref.dtype)


def out_block_forward(x_nchw, weight, *, max_rows_per_tile=512):
    """Out_Block forward.

    Args:
      x_nchw: (N, Cin, H, W) float32 input (PyTorch layout, kept as-is).
      weight: (Cout, Cin) float32 -- 1x1 conv weight squeezed from (Cout,Cin,1,1).
      max_rows_per_tile: sublane rows (of 128 lanes each) per grid step
        (multiple of 8); 512 rows * 128 lanes * Cin * 4B ~= 1 MiB input block.

    Returns:
      (N, Cout, H, W) float32 output (sigmoid if Cout==1 else softmax over C).
    """
    N, Cin, H, W = x_nchw.shape
    Cout = weight.shape[0]
    HW = H * W

    LANE = 128
    if HW % LANE == 0:
        L = LANE
        R = HW // LANE
    else:
        # TODO(synk): spatial sizes not divisible by 128 fall back to one
        # lane-major row per image (correct, just less sublane-dense).
        L = HW
        R = 1

    # Free, contiguous reshape of NCHW -> (N, Cin, R, L); no HBM transpose/pad.
    x4 = x_nchw.reshape(N, Cin, R, L)

    if R <= max_rows_per_tile:
        tr = R          # full image per block (block dim == full dim: legal)
        grid_r = 1
    else:
        tr = max_rows_per_tile            # multiple of 8
        grid_r = pl.cdiv(R, tr)           # ragged tail handled by Pallas masking

    use_sigmoid = (Cout == 1)
    kernel = functools.partial(
        _out_block_kernel, cin=Cin, cout=Cout, use_sigmoid=use_sigmoid)

    out = pl.pallas_call(
        kernel,
        out_shape=jax.ShapeDtypeStruct((N, Cout, R, L), jnp.float32),
        grid_spec=pltpu.PrefetchScalarGridSpec(
            num_scalar_prefetch=0,
            grid=(N, grid_r),
            in_specs=[
                # Tiny weight stays resident in SMEM (no per-step DMA stream).
                pl.BlockSpec(memory_space=pltpu.MemorySpace.SMEM),
                pl.BlockSpec((None, Cin, tr, L), lambda n, t: (n, 0, t, 0)),
            ],
            out_specs=pl.BlockSpec((None, Cout, tr, L),
                                   lambda n, t: (n, 0, t, 0)),
        ),
        compiler_params=pltpu.CompilerParams(
            dimension_semantics=("parallel", "parallel")),
    )(weight, x4)

    return out.reshape(N, Cout, H, W)


def _reference(x_nchw, weight):
    # Pure-JAX reference of the PyTorch module.
    Cout = weight.shape[0]
    y = jnp.einsum("nchw,oc->nohw", x_nchw, weight)
    if Cout == 1:
        return jax.nn.sigmoid(y)
    return jax.nn.softmax(y, axis=1)


if __name__ == "__main__":
    key = jax.random.PRNGKey(0)
    k_x, k_w1, k_w2 = jax.random.split(key, 3)

    N, Cin, H, W = 2, 4, 16, 16
    x = jax.random.normal(k_x, (N, Cin, H, W), dtype=jnp.float32)

    # Case 1: out_channel = 3 -> softmax over channel dim
    Cout_sm = 3
    w_sm = jax.random.normal(k_w1, (Cout_sm, Cin), dtype=jnp.float32) * 0.5
    out_sm = jax.block_until_ready(out_block_forward(x, w_sm))
    ref_sm = _reference(x, w_sm)
    assert out_sm.shape == (N, Cout_sm, H, W)
    assert jnp.allclose(out_sm, ref_sm, atol=1e-5, rtol=1e-5)

    # Case 2: out_channel = 1 -> sigmoid
    Cout_sig = 1
    w_sig = jax.random.normal(k_w2, (Cout_sig, Cin), dtype=jnp.float32) * 0.5
    out_sig = jax.block_until_ready(out_block_forward(x, w_sig))
    ref_sig = _reference(x, w_sig)
    assert out_sig.shape == (N, Cout_sig, H, W)
    assert jnp.allclose(out_sig, ref_sig, atol=1e-5, rtol=1e-5)

    print("KERNEL_OK")
</pallas_src>

<mosaic_0001>
module attributes {stable_mosaic.version = 11 : i64} {
  func.func @_out_block_kernel(%arg0: i32, %arg1: i32, %arg2: memref<3x4xf32, #tpu.memory_space<smem>>, %arg3: memref<1x4x2x128xf32, #tpu.memory_space<vmem>>, %arg4: memref<1x3x2x128xf32, #tpu.memory_space<vmem>>) attributes {dimension_semantics = [#tpu.dimension_semantics<parallel>, #tpu.dimension_semantics<parallel>], iteration_bounds = array<i64: 2, 1>, scalar_prefetch = 0 : i64, scratch_operands = 0 : i64, tpu.core_type = #tpu.core_type<tc>, window_params = [{transform_indices = @transform_0, window_bounds = array<i64: 3, 4>}, {transform_indices = @transform_1, window_bounds = array<i64: 1, 4, 2, 128>}, {transform_indices = @transform_2, window_bounds = array<i64: 1, 3, 2, 128>}]} {
    %c0 = arith.constant 0 : index
    %c0_0 = arith.constant 0 : index
    %c0_1 = arith.constant 0 : index
    %c0_2 = arith.constant 0 : index
    %0 = vector.load %arg3[%c0, %c0_0, %c0_1, %c0_2] : memref<1x4x2x128xf32, #tpu.memory_space<vmem>>, vector<1x1x2x128xf32>
    %1 = vector.shape_cast %0 : vector<1x1x2x128xf32> to vector<2x128xf32>
    %c0_3 = arith.constant 0 : index
    %c1 = arith.constant 1 : index
    %c0_4 = arith.constant 0 : index
    %c0_5 = arith.constant 0 : index
    %2 = vector.load %arg3[%c0_3, %c1, %c0_4, %c0_5] : memref<1x4x2x128xf32, #tpu.memory_space<vmem>>, vector<1x1x2x128xf32>
    %3 = vector.shape_cast %2 : vector<1x1x2x128xf32> to vector<2x128xf32>
    %c0_6 = arith.constant 0 : index
    %c2 = arith.constant 2 : index
    %c0_7 = arith.constant 0 : index
    %c0_8 = arith.constant 0 : index
    %4 = vector.load %arg3[%c0_6, %c2, %c0_7, %c0_8] : memref<1x4x2x128xf32, #tpu.memory_space<vmem>>, vector<1x1x2x128xf32>
    %5 = vector.shape_cast %4 : vector<1x1x2x128xf32> to vector<2x128xf32>
    %c0_9 = arith.constant 0 : index
    %c3 = arith.constant 3 : index
    %c0_10 = arith.constant 0 : index
    %c0_11 = arith.constant 0 : index
    %6 = vector.load %arg3[%c0_9, %c3, %c0_10, %c0_11] : memref<1x4x2x128xf32, #tpu.memory_space<vmem>>, vector<1x1x2x128xf32>
    %7 = vector.shape_cast %6 : vector<1x1x2x128xf32> to vector<2x128xf32>
    %c0_12 = arith.constant 0 : index
    %c0_13 = arith.constant 0 : index
    %8 = memref.load %arg2[%c0_12, %c0_13] : memref<3x4xf32, #tpu.memory_space<smem>>
    %9 = vector.broadcast %8 : f32 to vector<2x128xf32>
    %10 = arith.mulf %1, %9 : vector<2x128xf32>
    %c0_14 = arith.constant 0 : index
    %c1_15 = arith.constant 1 : index
    %11 = memref.load %arg2[%c0_14, %c1_15] : memref<3x4xf32, #tpu.memory_space<smem>>
    %12 = vector.broadcast %11 : f32 to vector<2x128xf32>
    %13 = arith.mulf %3, %12 : vector<2x128xf32>
    %14 = arith.addf %10, %13 : vector<2x128xf32>
    %c0_16 = arith.constant 0 : index
    %c2_17 = arith.constant 2 : index
    %15 = memref.load %arg2[%c0_16, %c2_17] : memref<3x4xf32, #tpu.memory_space<smem>>
    %16 = vector.broadcast %15 : f32 to vector<2x128xf32>
    %17 = arith.mulf %5, %16 : vector<2x128xf32>
    %18 = arith.addf %14, %17 : vector<2x128xf32>
    %c0_18 = arith.constant 0 : index
    %c3_19 = arith.constant 3 : index
    %19 = memref.load %arg2[%c0_18, %c3_19] : memref<3x4xf32, #tpu.memory_space<smem>>
    %20 = vector.broadcast %19 : f32 to vector<2x128xf32>
    %21 = arith.mulf %7, %20 : vector<2x128xf32>
    %22 = arith.addf %18, %21 : vector<2x128xf32>
    %c1_20 = arith.constant 1 : index
    %c0_21 = arith.constant 0 : index
    %23 = memref.load %arg2[%c1_20, %c0_21] : memref<3x4xf32, #tpu.memory_space<smem>>
    %24 = vector.broadcast %23 : f32 to vector<2x128xf32>
    %25 = arith.mulf %1, %24 : vector<2x128xf32>
    %c1_22 = arith.constant 1 : index
    %c1_23 = arith.constant 1 : index
    %26 = memref.load %arg2[%c1_22, %c1_23] : memref<3x4xf32, #tpu.memory_space<smem>>
    %27 = vector.broadcast %26 : f32 to vector<2x128xf32>
    %28 = arith.mulf %3, %27 : vector<2x128xf32>
    %29 = arith.addf %25, %28 : vector<2x128xf32>
    %c1_24 = arith.constant 1 : index
    %c2_25 = arith.constant 2 : index
    %30 = memref.load %arg2[%c1_24, %c2_25] : memref<3x4xf32, #tpu.memory_space<smem>>
    %31 = vector.broadcast %30 : f32 to vector<2x128xf32>
    %32 = arith.mulf %5, %31 : vector<2x128xf32>
    %33 = arith.addf %29, %32 : vector<2x128xf32>
    %c1_26 = arith.constant 1 : index
    %c3_27 = arith.constant 3 : index
    %34 = memref.load %arg2[%c1_26, %c3_27] : memref<3x4xf32, #tpu.memory_space<smem>>
    %35 = vector.broadcast %34 : f32 to vector<2x128xf32>
    %36 = arith.mulf %7, %35 : vector<2x128xf32>
    %37 = arith.addf %33, %36 : vector<2x128xf32>
    %c2_28 = arith.constant 2 : index
    %c0_29 = arith.constant 0 : index
    %38 = memref.load %arg2[%c2_28, %c0_29] : memref<3x4xf32, #tpu.memory_space<smem>>
    %39 = vector.broadcast %38 : f32 to vector<2x128xf32>
    %40 = arith.mulf %1, %39 : vector<2x128xf32>
    %c2_30 = arith.constant 2 : index
    %c1_31 = arith.constant 1 : index
    %41 = memref.load %arg2[%c2_30, %c1_31] : memref<3x4xf32, #tpu.memory_space<smem>>
    %42 = vector.broadcast %41 : f32 to vector<2x128xf32>
    %43 = arith.mulf %3, %42 : vector<2x128xf32>
    %44 = arith.addf %40, %43 : vector<2x128xf32>
    %c2_32 = arith.constant 2 : index
    %c2_33 = arith.constant 2 : index
    %45 = memref.load %arg2[%c2_32, %c2_33] : memref<3x4xf32, #tpu.memory_space<smem>>
    %46 = vector.broadcast %45 : f32 to vector<2x128xf32>
    %47 = arith.mulf %5, %46 : vector<2x128xf32>
    %48 = arith.addf %44, %47 : vector<2x128xf32>
    %c2_34 = arith.constant 2 : index
    %c3_35 = arith.constant 3 : index
    %49 = memref.load %arg2[%c2_34, %c3_35] : memref<3x4xf32, #tpu.memory_space<smem>>
    %50 = vector.broadcast %49 : f32 to vector<2x128xf32>
    %51 = arith.mulf %7, %50 : vector<2x128xf32>
    %52 = arith.addf %48, %51 : vector<2x128xf32>
    %53 = arith.maximumf %22, %37 : vector<2x128xf32>
    %54 = arith.maximumf %53, %52 : vector<2x128xf32>
    %55 = arith.subf %22, %54 : vector<2x128xf32>
    %56 = math.exp %55 : vector<2x128xf32>
    %57 = arith.subf %37, %54 : vector<2x128xf32>
    %58 = math.exp %57 : vector<2x128xf32>
    %59 = arith.subf %52, %54 : vector<2x128xf32>
    %60 = math.exp %59 : vector<2x128xf32>
    %61 = arith.addf %56, %58 : vector<2x128xf32>
    %62 = arith.addf %61, %60 : vector<2x128xf32>
    %63 = tpu.reciprocal %62 : vector<2x128xf32> -> vector<2x128xf32>
    %64 = arith.mulf %56, %63 : vector<2x128xf32>
    %c0_36 = arith.constant 0 : index
    %c0_37 = arith.constant 0 : index
    %c0_38 = arith.constant 0 : index
    %c0_39 = arith.constant 0 : index
    %65 = vector.load %arg4[%c0_36, %c0_37, %c0_38, %c0_39] : memref<1x3x2x128xf32, #tpu.memory_space<vmem>>, vector<1x1x2x128xf32>
    %66 = vector.shape_cast %65 : vector<1x1x2x128xf32> to vector<2x128xf32>
    %67 = vector.shape_cast %64 : vector<2x128xf32> to vector<1x1x2x128xf32>
    tpu.vector_store %arg4[%c0_36, %c0_37, %c0_38, %c0_39], %67 {strides = array<i32>} : memref<1x3x2x128xf32, #tpu.memory_space<vmem>>, vector<1x1x2x128xf32>,
    %68 = arith.mulf %58, %63 : vector<2x128xf32>
    %c0_40 = arith.constant 0 : index
    %c1_41 = arith.constant 1 : index
    %c0_42 = arith.constant 0 : index
    %c0_43 = arith.constant 0 : index
    %69 = vector.load %arg4[%c0_40, %c1_41, %c0_42, %c0_43] : memref<1x3x2x128xf32, #tpu.memory_space<vmem>>, vector<1x1x2x128xf32>
    %70 = vector.shape_cast %69 : vector<1x1x2x128xf32> to vector<2x128xf32>
    %71 = vector.shape_cast %68 : vector<2x128xf32> to vector<1x1x2x128xf32>
    tpu.vector_store %arg4[%c0_40, %c1_41, %c0_42, %c0_43], %71 {strides = array<i32>} : memref<1x3x2x128xf32, #tpu.memory_space<vmem>>, vector<1x1x2x128xf32>,
    %72 = arith.mulf %60, %63 : vector<2x128xf32>
    %c0_44 = arith.constant 0 : index
    %c2_45 = arith.constant 2 : index
    %c0_46 = arith.constant 0 : index
    %c0_47 = arith.constant 0 : index
    %73 = vector.load %arg4[%c0_44, %c2_45, %c0_46, %c0_47] : memref<1x3x2x128xf32, #tpu.memory_space<vmem>>, vector<1x1x2x128xf32>
    %74 = vector.shape_cast %73 : vector<1x1x2x128xf32> to vector<2x128xf32>
    %75 = vector.shape_cast %72 : vector<2x128xf32> to vector<1x1x2x128xf32>
    tpu.vector_store %arg4[%c0_44, %c2_45, %c0_46, %c0_47], %75 {strides = array<i32>} : memref<1x3x2x128xf32, #tpu.memory_space<vmem>>, vector<1x1x2x128xf32>,
    return
  }
  func.func @transform_0(%arg0: i32, %arg1: i32) -> (i32, i32) {
    %c0_i32 = arith.constant 0 : i32
    %c0_i32_0 = arith.constant 0 : i32
    %c0_i32_1 = arith.constant 0 : i32
    return %c0_i32, %c0_i32_0 : i32, i32
  }
  func.func @transform_1(%arg0: i32, %arg1: i32) -> (i32, i32, i32, i32) {
    %c0_i32 = arith.constant 0 : i32
    %c0_i32_0 = arith.constant 0 : i32
    %c0_i32_1 = arith.constant 0 : i32
    return %arg0, %c0_i32, %arg1, %c0_i32_0 : i32, i32, i32, i32
  }
  func.func @transform_2(%arg0: i32, %arg1: i32) -> (i32, i32, i32, i32) {
    %c0_i32 = arith.constant 0 : i32
    %c0_i32_0 = arith.constant 0 : i32
    %c0_i32_1 = arith.constant 0 : i32
    return %arg0, %c0_i32, %arg1, %c0_i32_0 : i32, i32, i32, i32
  }
}

</mosaic_0001>

<bundles_post_ra>
// kernel: tpu_custom_call.1
= control target key start
LH: loop header
LB: loop body
LE: loop exit
PB: predicated region body
PF: predicated region fallthrough
CT: control target
= control target key end

     0   :  { %7 = vsyncpa [#allocation5], 0  ;;  %s819_s0 = inlined_call_operand.hbm [shape: f32[3,4], index: 0, kind: input, shape index: {}]   ;;  %s820_s1 = inlined_call_operand.hbm [shape: f32[2,4,2,128], index: 1, kind: input, shape index: {}]   ;;  %s821_s2 = inlined_call_operand.hbm [shape: f32[2,3,2,128], index: 2, kind: output, shape index: {}]  }
   0x1   :  { %8 = vsyncpa [#allocation3], 0 }
   0x2   :  { %10 = vsyncpa [#allocation3 + $0x1], 0 }
   0x3   :  { %11 = vsyncpa [#allocation4], 0 }
   0x4   :  { %13 = vsyncpa [#allocation4 + $0x1], 0  ;;  %s667_s9 = smov 0   ;;  %s669_s10 = smov 0  }
   0x5   :  { %s671_s11 = smov 0   ;;  %s673_s12 = smov 0  }
   0x6   :  { %s675_s13 = smov 0   ;;  %s677_s14 = smov 0  }
   0x7 LB: > { %s396_s15 = sadd.s32 4294967295, %s645_s14   ;;  %s397_s16 = sadd.s32 4294967294, %s645_s14   ;;  %s645_s14 = sphi %s677_s14, %s19_s14   ;;  %s641_s13 = sphi %s675_s13, %s833_s13   ;;  %s637_s12 = sphi %s673_s12, %s832_s12   ;;  %s633_s11 = sphi %s671_s11, %s831_s11   ;;  %s629_s10 = sphi %s669_s10, %s830_s10   ;;  %s625_s9 = sphi %s667_s9, %s829_s9  }
   0x8   : > { %s61_s17 = sadd.s32 1, %s633_s11  ;;  %p68_p0 = scmp.ne.s32.totalorder %s633_s11, %s629_s10 }
   0x9   : > { %p69_p1 = scmp.eq.s32.totalorder %s645_s14, 0  ;;  %p74_p2 = scmp.ne.s32.totalorder %s629_s10, %s625_s9 }
   0xa   : > { %p705_p3 = scmp.eq.s32.totalorder %s396_s15, 0  ;;  %p100_p4 = scmp.eq.s32.totalorder %s396_s15, 1 }
   0xb   : > { %p709_p5 = por %p69_p1, %p68_p0  ;;  %p106_p6 = scmp.eq.s32.totalorder %s397_s16, 1 }
   0xc   : > { %p715_p7 = por %p705_p3, %p74_p2  ;;  %p719_p8 = por %p100_p4, %p68_p0 }
   0xd   : > { %p723_p9 = por %p106_p6, %p74_p2  ;;  %p398_p10 = scmp.ge.s32.totalorder %s645_s14, 1 }
   0xe   : > { %p113_p11 = scmp.lt.s32.totalorder %s645_s14, 3  ;;  %s125_s25 = sshll.u32 %s819_s0, 4  ;;  %s126_s25 = int_to_ptr.hbm [resolvable:$true] %s125_s25 }
   0xf   : > { %p400_p13 = scmp.ge.s32.totalorder %s645_s14, 2  ;;  %p450_p0 = scmp.lt.s32.totalorder %s645_s14, 2 }
  0x10   : > { %p732_p12 = pnand %p398_p10, %p113_p11  ;;  %s31_s28 = sadd.s32 1, %s641_s13 }
  0x11   : > { %p742_p2 = pnand %p450_p0, %p709_p5  ;;  %p33_p6 = scmp.ge.s32.totalorder %s31_s28, 2 }
  0x12   : > { %p437_p1 = pneg %p732_p12  ;;  %s136_s29 = sand.u32 1, %s633_s11  }
  0x13   : > { %s647_s30 = smov [#allocation2]   ;;  %s835_s28 = smov (%p33_p6, %s31_s28), 0 }
  0x14   : > { %p438_p4 = pnand %p437_p1, %p705_p3  ;;  %s401_s3 = sshll.u32 %s136_s29, 3 }
  0x15   : > { %s56_s4 = ssub.s32 %s641_s13, %s835_s28  ;;  %s426_s5 = sshll.u32 %s641_s13, 3 }
  0x16   : > { %440 = dma.hbm_to_smem (!%p438_p4), %s126_s25, 64, %s647_s30, [#allocation5]  }
  0x17   : > { %p59_p10 = scmp.eq.s32.totalorder %s56_s4, 0  ;;  %s146_s8 = scalar_lea.hbm %s820_s1, %s426_s5 }
  0x18   : > { %s140_s15 = scalar_lea.vmem [#allocation6], %s401_s3  ;;  %s147_s23 = sshll.u32 %s146_s8, 4  ;;  %s148_s23 = int_to_ptr.hbm [resolvable:$true] %s147_s23 }
  0x19   : > { %s149_s16 = sshll.u32 %s140_s15, 4  ;;  %s137_s24 = scalar_lea.sflag [#allocation3], %s136_s29  ;;  %s150_s16 = int_to_ptr.vmem [resolvable:$true] %s149_s16 }
  0x1a   : > { %s761_s19 = scalar_select %p59_p10, %s633_s11, %s61_s17  }
  0x1b   : > { %s648_s25 = smov 32   ;;  %s649_s30 = smov 2  }
  0x1c   : > { %444 = dma.hbm_to_vmem [thread:$0]  (!%p742_p2), %s148_s23, 128, %s150_s16, %s137_s24, %s648_s25, %s648_s25, %s649_s30  }
  0x1d   : > { %161 = sbr.rel (%p732_p12) target bundleno = 108 (0x6c), region = 28 }
  0x22   : > { %612 = dma.done.wait (%p705_p3), [#allocation5], 64  }
  0x23   : > { %614 = vsyncadd (%p705_p3), [#allocation5], 4294967232  ;;  %s772_s17 = sand.u32 1, %s629_s10  }
  0x24   : > { %s406_s29 = sshll.u32 %s772_s17, 3  ;;  %s169_s3 = scalar_lea.sflag [#allocation3], %s772_s17 }
  0x25   : > { %s172_s4 = scalar_lea.vmem [#allocation6], %s406_s29 }
  0x26   : > { %616 = dma.done.wait (%p715_p7), %s169_s3, 128  }
  0x27   : > { %618 = vsyncadd (%p715_p7), %s169_s3, 4294967168 }
  0x28   : > { %178 = sfence }
  0x29   : > { %s202_s26 = sld [smem:[#allocation2]]  ;;  %v195_v0 = vld [vmem:[%s172_s4] sm:$0x3]  ;;  %v407_v1 = vld [vmem:[%s172_s4 + $0x2] sm:$0x3]  ;;  %s427_s25 = smul.u32 6, %s772_s17 }
  0x2a   : > { %s410_s27 = sld [smem:[#allocation2 + $0x1]]  ;;  %v408_v2 = vld [vmem:[%s172_s4 + $0x4] sm:$0x3]  ;;  %v409_v8 = vld [vmem:[%s172_s4 + $0x6] sm:$0x3]  ;;  %s428_s30 = smul.u32 6, %s637_s12 }
  0x2b   : > { %s411_s5 = sld [smem:[#allocation2 + $0x2]]  ;;  %s283_s12 = scalar_lea.sflag [#allocation4], %s772_s17 }
  0x2c   : > { %s412_s18 = sld [smem:[#allocation2 + $0x3]]  ;;  %s295_s4 = scalar_lea.hbm %s821_s2, %s428_s30 }
  0x2d   : > { %s413_s6 = sld [smem:[#allocation2 + $0x80]] }
  0x2e   : > { %s414_s7 = sld [smem:[#allocation2 + $0x81]] }
  0x2f   : > { %v203_v3 = vstv %s202_s26  ;;  %s415_s8 = sld [smem:[#allocation2 + $0x82]]  ;;  %s194_s26 = scalar_lea.vmem [#allocation7], %s427_s25 }
  0x30   : > { %v204_v4 = vmul.f32 %v203_v3, %v195_v0  ;;  %v206_v5 = vstv %s410_s27  ;;  %s416_s15 = sld [smem:[#allocation2 + $0x83]]  ;;  %s296_s27 = sshll.u32 %s194_s26, 4  ;;  %s297_s27 = int_to_ptr.vmem [resolvable:$true] %s296_s27 }
  0x31   : > { %v207_v6 = vmul.f32 %v407_v1, %v206_v5  ;;  %v210_v7 = vstv %s411_s5  ;;  %s417_s16 = sld [smem:[#allocation2 + $0x100]]  ;;  %s298_s5 = sshll.u32 %s295_s4, 4  ;;  %s299_s5 = int_to_ptr.hbm [resolvable:$true] %s298_s5 }
  0x32   : > { %v211_v9 = vmul.f32 %v408_v2, %v210_v7  ;;  %v214_v10 = vstv %s412_s18  ;;  %s418_s20 = sld [smem:[#allocation2 + $0x101]]  ;;  %s573_s18 = sshra.s32 %s299_s5, 4  ;;  %s574_s18 = int_to_ptr.hbm [resolvable:$true] %s573_s18 }
  0x33   : > { %v208_v11 = vadd.f32 %v207_v6, %v204_v4  ;;  %v218_v12 = vstv %s413_s6  ;;  %s419_s23 = sld [smem:[#allocation2 + $0x102]]  ;;  %v215_v16 = vmul.f32 %v409_v8, %v214_v10  ;;  %s575_s6 = scalar_lea.hbm %s574_s18, 6 }
  0x34   : > { %v219_v13 = vmul.f32 %v218_v12, %v195_v0  ;;  %v221_v14 = vstv %s414_s7  ;;  %s420_s24 = sld [smem:[#allocation2 + $0x103]]  ;;  %p576_p3 = scmp.ne.s32.totalorder %s574_s18, %s575_s6 }
  0x35   : > { %v212_v15 = vadd.f32 %v211_v9, %v208_v11  ;;  %v222_v17 = vmul.f32 %v407_v1, %v221_v14  ;;  %v225_v18 = vstv %s415_s8  ;;  %p580_p11 = scmp.lt.s32.totalorder %s574_s18, %s821_s2 }
  0x36   : > { %v226_v19 = vmul.f32 %v408_v2, %v225_v18  ;;  %v229_v20 = vstv %s416_s15  ;;  %p577_p5 = pnand %p576_p3, %p719_p8  ;;  %s579_s15 = scalar_lea.hbm %s821_s2, 12 }
  0x37   : > { %v223_v21 = vadd.f32 %v222_v17, %v219_v13  ;;  %v230_v22 = vmul.f32 %v409_v8, %v229_v20  ;;  %v233_v23 = vstv %s417_s16  ;;  %v216_v26 = vadd.f32 %v215_v16, %v212_v15  ;;  %p581_p12 = scmp.lt.s32.totalorder %s579_s15, %s575_s6 }
  0x38   : > { %v234_v24 = vmul.f32 %v233_v23, %v195_v0  ;;  %v236_v25 = vstv %s418_s20  ;;  %p578_p7 = pneg %p577_p5 }
  0x39   : > { %v227_v27 = vadd.f32 %v226_v19, %v223_v21  ;;  %v237_v28 = vmul.f32 %v407_v1, %v236_v25  ;;  %v240_v29 = vstv %s419_s23  ;;  %p582_p0 = por %p581_p12, %p580_p11 }
  0x3a   : > { %v241_v30 = vmul.f32 %v408_v2, %v240_v29  ;;  %v244_v31 = vstv %s420_s24 }
  0x3b   : > { %v231_v32 = vadd.f32 %v230_v22, %v227_v27  ;;  %v238_v33 = vadd.f32 %v237_v28, %v234_v24  ;;  %v245_v34 = vmul.f32 %v409_v8, %v244_v31  ;;  %p583_p1 = pnand %p582_p0, %p578_p7 }
  0x3d   : > { %v242_v35 = vadd.f32 %v241_v30, %v238_v33  ;;  %v247_v36 = vmax.f32 %v216_v26, %v231_v32 }
  0x3f   : > { %v246_v37 = vadd.f32 %v245_v34, %v242_v35 }
  0x41   : > { %v248_v38 = vmax.f32 %v247_v36, %v246_v37 }
  0x43   : > { %v249_v39 = vsub.f32 %v216_v26, %v248_v38  ;;  %v252_v40 = vsub.f32 %v231_v32, %v248_v38  ;;  %v255_v41 = vsub.f32 %v246_v37, %v248_v38 }
  0x45   : > { %v250_v42 = vmul.f32 1.442695, %v249_v39  ;;  %v253_v43 = vmul.f32 1.442695, %v252_v40  ;;  %v256_v44 = vmul.f32 1.442695, %v255_v41 }
  0x47   : > { %506 = vpow2.f32 %v250_v42 }
  0x48   : > { %508 = vpow2.f32 %v253_v43 }
  0x49   : > { %510 = vpow2.f32 %v256_v44 }
  0x4d   : > { %v507_v45 = vpop.eup %506 }
  0x4e   : > { %v509_v46 = vpop.eup %508 }
  0x4f   : > { %v511_v47 = vpop.eup %510  ;;  %v258_v48 = vadd.f32 %v509_v46, %v507_v45 }
  0x51   : > { %v259_v49 = vadd.f32 %v511_v47, %v258_v48 }
  0x53   : > { %512 = vrcp.f32 %v259_v49  ;;  %v271_v52 = vand.u32 2147483648, %v259_v49  ;;  %vm265_vm0 = vweird.f32 %v259_v49  ;;  %v269_v54 = vand.u32 2147483647, %v259_v49 }
  0x55   : > { %v272_v56 = vor.u32 1.1754944e-38, %v271_v52  ;;  %vm270_vm3 = vcmp.eq.f32.partialorder %v269_v54, 8.507059e+37 }
  0x59   : > { %v513_v50 = vpop.eup %512 }
  0x5a   : > { %v261_v51 = vmul.f32 %v513_v50, %v259_v49  ;;  %vm266_vm1 = vweird.f32 %v513_v50 }
  0x5b   : > { %vm267_vm2 = vmor %vm265_vm0, %vm266_vm1 }
  0x5c   : > { %v262_v53 = vsub.f32 1.0, %v261_v51 }
  0x5e   : > { %v263_v55 = vmul.f32 %v513_v50, %v262_v53 }
  0x60   : > { %v264_v57 = vadd.f32 %v513_v50, %v263_v55 }
  0x62   : > { %v268_v58 = vsel %vm267_vm2, %v513_v50, %v264_v57 }
  0x63   : > { %v273_v59 = vsel %vm270_vm3, %v272_v56, %v268_v58 }
  0x64   : > { %v274_v60 = vmul.f32 %v507_v45, %v273_v59  ;;  %v276_v61 = vmul.f32 %v509_v46, %v273_v59  ;;  %v279_v62 = vmul.f32 %v511_v47, %v273_v59 }
  0x66   : > { %275 = vst [vmem:[%s194_s26] sm:$0x3] %v274_v60 }
  0x67   : > { %421 = vst [vmem:[%s194_s26 + $0x2] sm:$0x3] %v276_v61 }
  0x68   : > { %422 = vst [vmem:[%s194_s26 + $0x4] sm:$0x3] %v279_v62 }
  0x69   : > { %586 = shalt.err (!%p583_p1)
}
  0x6a   : > { %s650_s17 = smov 32   ;;  %s651_s23 = smov 2  }
  0x6b   : > { %435 = dma.vmem_to_hbm [thread:$0]  (%p719_p8), %s297_s27, 96, %s299_s5, %s283_s12, %s650_s17, %s650_s17, %s651_s23  }
  0x6c PF: > { %s313_s24 = sand.u32 1, %s625_s9   ;;  %p446_p2 = pnand %p400_p13, %p723_p9 }
  0x6d   : > { %s314_s25 = scalar_lea.sflag [#allocation4], %s313_s24 }
  0x6e   : > { %p447_p4 = pneg %p446_p2 }
  0x70   : > { %620 = dma.done.wait (%p447_p4), %s314_s25, 96  }
  0x71   : > { %622 = vsyncadd (%p447_p4), %s314_s25, 4294967200  ;;  %s19_s14 = sadd.s32 1, %s645_s14   ;;  %s829_s9 = smov %s629_s10 }
  0x72   : > { %p16_p6 = scmp.ge.s32.totalorder %s19_s14, 4   ;;  %s830_s10 = smov %s633_s11 }
  0x73   : > { %s831_s11 = smov %s761_s19  ;;  %s832_s12 = smov %s641_s13 }
  0x74   : > { %s833_s13 = smov %s835_s28  ;;  %18 = sbr.rel (!%p16_p6) target bundleno = 7 (0x7), region = 83 }
  0x79   :  { %320 = vsyncpa [#allocation3], 1 }
  0x7a   :  { %322 = vsyncpa [#allocation3 + $0x1], 1 }
  0x7b   :  { %323 = vsyncpa [#allocation4], 1 }
  0x7c   :  { %325 = vsyncpa [#allocation4 + $0x1], 1 }
  0x7d   :  { %326 = vsyncpa [#allocation5], 1 }
  0x7e   :  { %328 = vsyncpa [#allocation5 + $0x1], 1 }

</bundles_post_ra>
